<compile_context>
chip_gen: v7x
topology: tpu7x:2x2x1
jax: 0.10.0
libtpu: 0.0.40
codegen_flags: <defaults>
</compile_context>

<pallas_src>
import functools
import numpy as np
import jax
import jax.numpy as jnp
from jax.experimental import pallas as pl
from jax.experimental.pallas import tpu as pltpu


def _round_up(x, m):
    return ((x + m - 1) // m) * m


def _build_basis(n_fft, win_length, onesided, window):
    """Windowed DFT basis (numpy, built once), re/im interleaved along columns.

    Column 2f = Re(freq f), column 2f+1 = Im(freq f).  If nyq_in_dc, the
    real-only Nyquist bin basis is packed into the always-zero Im(DC) column
    (column 1) so f_pad = n_fft//2 is exactly lane-dense; the wrapper unpacks.
    Returned as a cached bf16 device array (bf16 MXU operands, f32 accumulate).
    """
    if window == "hann":
        m = np.arange(win_length, dtype=np.float64)
        # torch.hann_window is periodic: 0.5 - 0.5*cos(2*pi*n/N)
        win = 0.5 - 0.5 * np.cos(2.0 * np.pi * m / win_length)
    elif window is None:
        win = np.ones((win_length,), np.float64)
    else:
        raise ValueError(f"{window} window is not implemented")
    pad_l = (n_fft - win_length) // 2
    wfull = np.zeros((n_fft,), np.float64)
    wfull[pad_l:pad_l + win_length] = win

    n_freq = n_fft // 2 + 1 if onesided else n_fft
    half = n_fft // 2
    nyq_in_dc = bool(onesided and n_fft % 2 == 0 and half % 128 == 0)
    f_pad = half if nyq_in_dc else _round_up(n_freq, 128)

    n = np.arange(n_fft, dtype=np.int64)[:, None]
    f = np.arange(f_pad, dtype=np.int64)[None, :]
    ang = (2.0 * np.pi / n_fft) * ((n * f) % n_fft)      # exact phase (no big-angle error)
    br = wfull[:, None] * np.cos(ang)                     # (n_fft, f_pad)
    bi = -wfull[:, None] * np.sin(ang)
    if nyq_in_dc:
        # Re(Nyquist) basis = w[n] * (-1)^n, stashed in the Im(DC) column.
        bi[:, 0] = wfull * np.cos(np.pi * np.arange(n_fft))
    else:
        br[:, n_freq:] = 0.0
        bi[:, n_freq:] = 0.0
    basis = np.stack([br, bi], axis=-1).reshape(n_fft, 2 * f_pad)
    return jnp.asarray(basis, dtype=jnp.bfloat16), n_freq, f_pad, nyq_in_dc


def _stft_kernel(olens_ref, *refs, tt, row_w, r):
    if r > 1:
        body_ref, tail_ref, basis_ref, out_ref, frames_ref = refs
    else:
        body_ref, basis_ref, out_ref = refs

    b = pl.program_id(0)
    t0 = pl.program_id(1) * tt
    f2 = out_ref.shape[-1]

    if r > 1:
        # (tt + tail_rows, hop) raw signal rows covering this frame tile.
        slab = jnp.concatenate([body_ref[0], tail_ref[0]], axis=0)
        n_rows = slab.shape[0]
        # Polyphase assembly of the (tt, n_fft) bf16 LHS.  Row shifts go
        # through pltpu.roll (XLU); every slice below starts at sublane 0,
        # so no misaligned-sublane relayout copies are generated.
        for k in range(r):
            rows = slab if k == 0 else pltpu.roll(slab, shift=n_rows - k, axis=0)
            frames_ref[:, k * row_w:(k + 1) * row_w] = rows[0:tt, :].astype(jnp.bfloat16)
        lhs = frames_ref[...]
    else:
        lhs = body_ref[0].astype(jnp.bfloat16)            # (tt, n_fft)

    # Single MXU matmul per tile, K = n_fft, bf16 x bf16 -> f32 accumulation.
    acc = jnp.dot(lhs, basis_ref[...], preferred_element_type=jnp.float32)

    olen = olens_ref[b]

    @pl.when(t0 + tt <= olen)            # fully-valid tile: straight lane-dense store
    def _():
        out_ref[0] = acc

    @pl.when(t0 + tt > olen)             # tile straddles/exceeds olen: mask padded frames
    def _():
        t_idx = t0 + jax.lax.broadcasted_iota(jnp.int32, (tt, f2), 0)
        out_ref[0] = jnp.where(t_idx < olen, acc, 0.0)


class StftPallas:
    """JAX/Pallas port of espnet Stft (forward only)."""

    def __init__(self, n_fft=512, win_length=None, hop_length=128, window="hann",
                 center=True, normalized=False, onesided=True):
        self.n_fft = n_fft
        self.win_length = n_fft if win_length is None else win_length
        self.hop_length = hop_length
        self.center = center
        self.normalized = normalized
        self.onesided = onesided
        if window is not None and window != "hann":
            raise ValueError(f"{window} window is not implemented")
        self.window = window
        # Basis depends only on static config -> build once and cache (bf16).
        self._basis, self._n_freq, self._f_pad, self._nyq_in_dc = _build_basis(
            n_fft, self.win_length, onesided, window)

    def __call__(self, x, ilens=None):
        x = jnp.asarray(x, jnp.float32)
        bs = x.shape[0]
        multi_channel = x.ndim == 3
        if multi_channel:
            n_ch = x.shape[2]
            nsamples = x.shape[1]
            x2d = jnp.transpose(x, (0, 2, 1)).reshape(bs * n_ch, nsamples)
        else:
            n_ch = 1
            x2d = x
        bflat = x2d.shape[0]
        n_fft, hop = self.n_fft, self.hop_length
        n_freq, f_pad, nyq_in_dc = self._n_freq, self._f_pad, self._nyq_in_dc
        f2 = 2 * f_pad
        basis = self._basis

        # reflect pad like torch.stft(center=True)
        if self.center:
            p = n_fft // 2
            xp = jnp.pad(x2d, ((0, 0), (p, p)), mode="reflect")
        else:
            xp = x2d
        padded_len = xp.shape[1]
        n_frames = (padded_len - n_fft) // hop + 1

        # ---- frame-axis tiling ----
        if n_fft % hop == 0:
            r = n_fft // hop          # frames assembled in-kernel from hop-wide rows
            row_w = hop
        else:
            # TODO(synk): generalize in-kernel framing to gcd(n_fft, hop)-wide rows
            # instead of pre-gathering full frames (n_fft/hop x larger in HBM).
            r = 1
            row_w = n_fft
        tail_rows = _round_up(max(r - 1, 1), 8) if r > 1 else 0
        step = max(tail_rows, 8)
        tt = min(512, _round_up(n_frames, 8))
        tt = _round_up(tt, step)

        # Keep well under the 32 MiB scoped-VMEM limit (also safe on v7x 64 MiB).
        def _vmem_bytes(t):
            return (2 * t * f2 * 4                         # double-buffered output tile
                    + 2 * n_fft * f2 * 2                   # double-buffered bf16 basis
                    + 2 * (t + tail_rows) * row_w * 4      # body (+tail) tiles
                    + t * n_fft * 2 + t * f2 * 4)          # frames scratch + dot result
        while tt > step and _vmem_bytes(tt) > 24 * 1024 * 1024:
            tt = _round_up(tt // 2, step)
        n_tiles = -(-n_frames // tt)
        t_pad = n_tiles * tt

        if r > 1:
            n_rows = t_pad + tail_rows
            need = n_rows * row_w
            if padded_len < need:
                sig = jnp.pad(xp, ((0, 0), (0, need - padded_len)))
            else:
                sig = xp[:, :need]
            sig = sig.reshape(bflat, n_rows, row_w)                 # hop-wide rows
        else:
            need = (t_pad - 1) * hop + n_fft
            xpp = jnp.pad(xp, ((0, 0), (0, max(0, need - padded_len))))
            idx = (jnp.arange(t_pad) * hop)[:, None] + jnp.arange(n_fft)[None, :]
            sig = xpp[:, idx]                                       # (bflat, t_pad, n_fft)

        # ---- frame-level lengths for masking (same formula as the torch module) ----
        if ilens is not None:
            ilens = jnp.asarray(ilens, jnp.int32)
            eff = ilens + (2 * (n_fft // 2) if self.center else 0)
            olens = (eff - n_fft) // hop + 1
            olens_flat = jnp.repeat(olens, n_ch) if multi_channel else olens
        else:
            olens = None
            # t_pad (not n_frames) so every tile takes the unmasked fast path.
            olens_flat = jnp.full((bflat,), t_pad, jnp.int32)

        kernel = functools.partial(_stft_kernel, tt=tt, row_w=row_w, r=r)
        body_spec = pl.BlockSpec((1, tt, row_w), lambda b, t, ol: (b, t, 0))
        # TODO(synk): for very large n_fft on v7x, mark basis_spec with
        # pipeline_mode=pl.Buffered(1) (its index_map is constant) to halve the
        # resident basis footprint.
        basis_spec = pl.BlockSpec((n_fft, f2), lambda b, t, ol: (0, 0))
        out_spec = pl.BlockSpec((1, tt, f2), lambda b, t, ol: (b, t, 0))
        if r > 1:
            tail_spec = pl.BlockSpec(
                (1, tail_rows, row_w),
                lambda b, t, ol: (b, (t + 1) * (tt // tail_rows), 0))
            in_specs = [body_spec, tail_spec, basis_spec]
            operands = (olens_flat.astype(jnp.int32), sig, sig, basis)
            scratch_shapes = [pltpu.VMEM((tt, n_fft), jnp.bfloat16)]
        else:
            in_specs = [body_spec, basis_spec]
            operands = (olens_flat.astype(jnp.int32), sig, basis)
            scratch_shapes = []

        flops = 2 * bflat * t_pad * n_fft * f2
        bytes_accessed = (4 * bflat * t_pad * row_w
                          + 4 * bflat * n_tiles * tail_rows * row_w
                          + 2 * basis.size
                          + 4 * bflat * t_pad * f2)

        out = pl.pallas_call(
            kernel,
            out_shape=jax.ShapeDtypeStruct((bflat, t_pad, f2), jnp.float32),
            grid_spec=pltpu.PrefetchScalarGridSpec(
                num_scalar_prefetch=1,
                grid=(bflat, n_tiles),
                in_specs=in_specs,
                out_specs=out_spec,
                scratch_shapes=scratch_shapes,
            ),
            compiler_params=pltpu.CompilerParams(
                dimension_semantics=("parallel", "parallel"),
                # explicit raise: v5e default scoped VMEM is only 16 MiB
                vmem_limit_bytes=32 * 1024 * 1024,
            ),
            cost_estimate=pl.CostEstimate(flops=int(flops), transcendentals=0,
                                          bytes_accessed=int(bytes_accessed)),
        )(*operands)

        # interleaved (bflat, t_pad, 2*f_pad) -> (bflat, n_frames, n_freq, 2)
        out = out.reshape(bflat, t_pad, f_pad, 2)[:, :n_frames]
        if nyq_in_dc:
            nyq_re = out[:, :, 0, 1]
            zeros = jnp.zeros_like(nyq_re)
            dc = jnp.stack([out[:, :, 0, 0], zeros], axis=-1)[:, :, None, :]
            nyq = jnp.stack([nyq_re, zeros], axis=-1)[:, :, None, :]
            out = jnp.concatenate([dc, out[:, :, 1:, :], nyq], axis=2)
        else:
            out = out[:, :, :n_freq, :]
        if self.normalized:
            out = out * (float(n_fft) ** -0.5)   # torch.stft normalizes by sqrt(n_fft)
        if multi_channel:
            out = out.reshape(bs, n_ch, n_frames, n_freq, 2)
            out = jnp.transpose(out, (0, 2, 1, 3, 4))      # (B, T, C, F, 2)
        return out, olens


def _reference(x, ilens, stft: "StftPallas"):
    """Pure-JAX reference using rfft, same semantics as the torch.stft path."""
    n_fft, hop = stft.n_fft, stft.hop_length
    if stft.center:
        p = n_fft // 2
        xp = jnp.pad(x, ((0, 0), (p, p)), mode="reflect")
    else:
        xp = x
    n_frames = (xp.shape[1] - n_fft) // hop + 1
    idx = (jnp.arange(n_frames) * hop)[:, None] + jnp.arange(n_fft)[None, :]
    frames = xp[:, idx]
    if stft.window == "hann":
        m = jnp.arange(stft.win_length, dtype=jnp.float32)
        win = 0.5 - 0.5 * jnp.cos(2.0 * jnp.pi * m / stft.win_length)
    else:
        win = jnp.ones((stft.win_length,), jnp.float32)
    pad_l = (n_fft - stft.win_length) // 2
    win = jnp.pad(win, (pad_l, n_fft - stft.win_length - pad_l))
    if stft.onesided:
        spec = jnp.fft.rfft(frames * win[None, None, :], axis=-1)
    else:
        spec = jnp.fft.fft(frames * win[None, None, :], axis=-1)
    out = jnp.stack([spec.real, spec.imag], -1).astype(jnp.float32)
    if stft.normalized:
        out = out * (float(n_fft) ** -0.5)
    if ilens is not None:
        ilens = jnp.asarray(ilens, jnp.int32)
        eff = ilens + (2 * (n_fft // 2) if stft.center else 0)
        olens = (eff - n_fft) // hop + 1
        mask = jnp.arange(n_frames)[None, :] < olens[:, None]
        out = out * mask[:, :, None, None].astype(out.dtype)
    return out


def _assert_close(a, b, name, fro_rel=1e-2, max_rel=6e-2):
    """Tolerances sized for bf16 MXU operands (f32 accumulation) vs f32 rfft ref."""
    a = np.asarray(a, np.float64)
    b = np.asarray(b, np.float64)
    scale = np.sqrt(np.mean(b * b)) + 1e-12
    fro = np.sqrt(np.mean((a - b) ** 2)) / scale
    mx = np.max(np.abs(a - b)) / scale
    assert fro < fro_rel and mx < max_rel, f"{name}: fro={fro:.3e} max={mx:.3e}"


if __name__ == "__main__":
    key = jax.random.PRNGKey(0)
    B, NSAMP = 2, 256
    x = jax.random.normal(key, (B, NSAMP), dtype=jnp.float32)
    ilens = jnp.array([256, 200], dtype=jnp.int32)

    # 1) Main path: hop | n_fft -> in-kernel polyphase framing (f_pad rounded to 128).
    stft = StftPallas(n_fft=64, win_length=64, hop_length=16, window="hann",
                      center=True, normalized=False, onesided=True)
    out, olens = stft(x, ilens)
    out = jax.block_until_ready(out)
    ref = _reference(x, ilens, stft)
    _assert_close(out, ref, "main")
    assert out.shape == (B, NSAMP // 16 + 1, 64 // 2 + 1, 2)
    assert np.array_equal(np.asarray(olens), np.array([17, 13]))
    assert np.all(np.asarray(out)[1, 13:] == 0.0)          # masked frames exactly zero

    # 2) Nyquist-in-DC-imag path (n_fft % 256 == 0 -> exactly lane-dense output), with masking.
    stft_nyq = StftPallas(n_fft=256, win_length=256, hop_length=64)
    ilens2 = jnp.array([256, 190], dtype=jnp.int32)
    out_n, olens_n = stft_nyq(x, ilens2)
    out_n = jax.block_until_ready(out_n)
    ref_n = _reference(x, ilens2, stft_nyq)
    _assert_close(out_n, ref_n, "nyquist")
    assert out_n.shape == (B, 5, 129, 2)
    assert np.array_equal(np.asarray(olens_n), np.array([5, 3]))

    # 3) Fallback path: hop does not divide n_fft, no ilens (no masking).
    stft2 = StftPallas(n_fft=32, win_length=32, hop_length=12)
    out2, olens2 = stft2(x, None)
    out2 = jax.block_until_ready(out2)
    ref2 = _reference(x, None, stft2)
    _assert_close(out2, ref2, "fallback")
    assert olens2 is None

    # 4) Multi-channel input: (B, Nsamples, C) -> (B, T, C, F, 2)
    xc = jax.random.normal(jax.random.PRNGKey(1), (B, NSAMP, 3), dtype=jnp.float32)
    outc, _ = stft(xc, ilens)
    outc = jax.block_until_ready(outc)
    assert outc.shape == (B, 17, 3, 33, 2)
    refc0 = _reference(xc[:, :, 0], ilens, stft)
    _assert_close(outc[:, :, 0], refc0, "multichannel")

    print("KERNEL_OK")
</pallas_src>

<mosaic_0001>
module attributes {stable_mosaic.version = 11 : i64} {
  func.func @_stft_kernel(%arg0: i32, %arg1: i32, %arg2: memref<2xi32, #tpu.memory_space<smem>>, %arg3: memref<1x24x16xf32, #tpu.memory_space<vmem>>, %arg4: memref<1x8x16xf32, #tpu.memory_space<vmem>>, %arg5: memref<64x256xbf16, #tpu.memory_space<vmem>>, %arg6: memref<1x24x256xf32, #tpu.memory_space<vmem>>, %arg7: memref<24x64xbf16, #tpu.memory_space<vmem>>) attributes {dimension_semantics = [#tpu.dimension_semantics<parallel>, #tpu.dimension_semantics<parallel>], iteration_bounds = array<i64: 2, 1>, scalar_prefetch = 1 : i64, scratch_operands = 1 : i64, tpu.core_type = #tpu.core_type<tc>, window_params = [{transform_indices = @transform_0, window_bounds = array<i64: 1, 24, 16>}, {transform_indices = @transform_1, window_bounds = array<i64: 1, 8, 16>}, {pipeline_mode = #tpu.pipeline_mode<synchronous>, transform_indices = @transform_2, window_bounds = array<i64: 64, 256>}, {transform_indices = @transform_3, window_bounds = array<i64: 1, 24, 256>}]} {
    %c24_i32 = arith.constant 24 : i32
    %0 = arith.muli %arg1, %c24_i32 : i32
    %c0 = arith.constant 0 : index
    %c0_0 = arith.constant 0 : index
    %c0_1 = arith.constant 0 : index
    %1 = vector.load %arg3[%c0, %c0_0, %c0_1] : memref<1x24x16xf32, #tpu.memory_space<vmem>>, vector<1x24x16xf32>
    %2 = vector.shape_cast %1 : vector<1x24x16xf32> to vector<24x16xf32>
    %c0_2 = arith.constant 0 : index
    %c0_3 = arith.constant 0 : index
    %c0_4 = arith.constant 0 : index
    %3 = vector.load %arg4[%c0_2, %c0_3, %c0_4] : memref<1x8x16xf32, #tpu.memory_space<vmem>>, vector<1x8x16xf32>
    %4 = vector.shape_cast %3 : vector<1x8x16xf32> to vector<8x16xf32>
    %5 = tpu.concatenate %2, %4 in 0 : vector<24x16xf32>, vector<8x16xf32> -> vector<32x16xf32>
    %6 = vector.extract_strided_slice %5 {offsets = [0, 0], sizes = [24, 16], strides = [1, 1]} : vector<32x16xf32> to vector<24x16xf32>
    %7 = arith.truncf %6 : vector<24x16xf32> to vector<24x16xbf16>
    %c0_5 = arith.constant 0 : index
    %c0_6 = arith.constant 0 : index
    %8 = vector.load %arg7[%c0_5, %c0_6] : memref<24x64xbf16, #tpu.memory_space<vmem>>, vector<24x16xbf16>
    tpu.vector_store %arg7[%c0_5, %c0_6], %7 {strides = array<i32>} : memref<24x64xbf16, #tpu.memory_space<vmem>>, vector<24x16xbf16>,
    %c31_i32 = arith.constant 31 : i32
    %9 = tpu.dynamic_rotate %5 by %c31_i32 dim 0 : vector<32x16xf32>, i32 -> vector<32x16xf32>
    %10 = vector.extract_strided_slice %9 {offsets = [0, 0], sizes = [24, 16], strides = [1, 1]} : vector<32x16xf32> to vector<24x16xf32>
    %11 = arith.truncf %10 : vector<24x16xf32> to vector<24x16xbf16>
    %c0_7 = arith.constant 0 : index
    %c16 = arith.constant 16 : index
    %12 = vector.load %arg7[%c0_7, %c16] : memref<24x64xbf16, #tpu.memory_space<vmem>>, vector<24x16xbf16>
    tpu.vector_store %arg7[%c0_7, %c16], %11 {strides = array<i32>} : memref<24x64xbf16, #tpu.memory_space<vmem>>, vector<24x16xbf16>,
    %c30_i32 = arith.constant 30 : i32
    %13 = tpu.dynamic_rotate %5 by %c30_i32 dim 0 : vector<32x16xf32>, i32 -> vector<32x16xf32>
    %14 = vector.extract_strided_slice %13 {offsets = [0, 0], sizes = [24, 16], strides = [1, 1]} : vector<32x16xf32> to vector<24x16xf32>
    %15 = arith.truncf %14 : vector<24x16xf32> to vector<24x16xbf16>
    %c0_8 = arith.constant 0 : index
    %c32 = arith.constant 32 : index
    %16 = vector.load %arg7[%c0_8, %c32] : memref<24x64xbf16, #tpu.memory_space<vmem>>, vector<24x16xbf16>
    tpu.vector_store %arg7[%c0_8, %c32], %15 {strides = array<i32>} : memref<24x64xbf16, #tpu.memory_space<vmem>>, vector<24x16xbf16>,
    %c29_i32 = arith.constant 29 : i32
    %17 = tpu.dynamic_rotate %5 by %c29_i32 dim 0 : vector<32x16xf32>, i32 -> vector<32x16xf32>
    %18 = vector.extract_strided_slice %17 {offsets = [0, 0], sizes = [24, 16], strides = [1, 1]} : vector<32x16xf32> to vector<24x16xf32>
    %19 = arith.truncf %18 : vector<24x16xf32> to vector<24x16xbf16>
    %c0_9 = arith.constant 0 : index
    %c48 = arith.constant 48 : index
    %20 = vector.load %arg7[%c0_9, %c48] : memref<24x64xbf16, #tpu.memory_space<vmem>>, vector<24x16xbf16>
    tpu.vector_store %arg7[%c0_9, %c48], %19 {strides = array<i32>} : memref<24x64xbf16, #tpu.memory_space<vmem>>, vector<24x16xbf16>,
    %c0_10 = arith.constant 0 : index
    %c0_11 = arith.constant 0 : index
    %21 = vector.load %arg7[%c0_10, %c0_11] : memref<24x64xbf16, #tpu.memory_space<vmem>>, vector<24x64xbf16>
    %c0_12 = arith.constant 0 : index
    %c0_13 = arith.constant 0 : index
    %22 = vector.load %arg5[%c0_12, %c0_13] : memref<64x256xbf16, #tpu.memory_space<vmem>>, vector<64x256xbf16>
    %cst = arith.constant dense<0.000000e+00> : vector<24x256xf32>
    %23 = tpu.matmul %21, %22, %cst {dimension_numbers = #tpu.dot_dimension_numbers<[1], [0], [0], [1], [0, 0, 1, 1], [], []>} : vector<24x64xbf16>, vector<64x256xbf16>, vector<24x256xf32> -> vector<24x256xf32>
    %24 = arith.index_cast %arg0 : i32 to index
    %25 = memref.load %arg2[%24] : memref<2xi32, #tpu.memory_space<smem>>
    %c24_i32_14 = arith.constant 24 : i32
    %26 = arith.addi %0, %c24_i32_14 : i32
    %27 = arith.cmpi sle, %26, %25 : i32
    %28 = arith.extui %27 : i1 to i32
    %c0_i32 = arith.constant 0 : i32
    %29 = arith.cmpi ne, %28, %c0_i32 : i32
    scf.if %29 {
      %c0_17 = arith.constant 0 : index
      %c0_18 = arith.constant 0 : index
      %c0_19 = arith.constant 0 : index
      %34 = vector.load %arg6[%c0_17, %c0_18, %c0_19] : memref<1x24x256xf32, #tpu.memory_space<vmem>>, vector<1x24x256xf32>
      %35 = vector.shape_cast %34 : vector<1x24x256xf32> to vector<24x256xf32>
      %36 = vector.shape_cast %23 : vector<24x256xf32> to vector<1x24x256xf32>
      tpu.vector_store %arg6[%c0_17, %c0_18, %c0_19], %36 {strides = array<i32>} : memref<1x24x256xf32, #tpu.memory_space<vmem>>, vector<1x24x256xf32>,
    } else {
    }
    %c24_i32_15 = arith.constant 24 : i32
    %30 = arith.addi %0, %c24_i32_15 : i32
    %31 = arith.cmpi sgt, %30, %25 : i32
    %32 = arith.extui %31 : i1 to i32
    %c0_i32_16 = arith.constant 0 : i32
    %33 = arith.cmpi ne, %32, %c0_i32_16 : i32
    scf.if %33 {
      %34 = tpu.iota {dimensions = array<i32: 0>} : vector<24x256xi32>
      %35 = vector.broadcast %0 : i32 to vector<24x256xi32>
      %36 = arith.addi %35, %34 : vector<24x256xi32>
      %37 = vector.broadcast %25 : i32 to vector<24x256xi32>
      %38 = arith.cmpi slt, %36, %37 : vector<24x256xi32>
      %cst_17 = arith.constant 0.000000e+00 : f32
      %39 = vector.broadcast %cst_17 : f32 to vector<24x256xf32>
      %40 = arith.select %38, %23, %39 : vector<24x256xi1>, vector<24x256xf32>
      %c0_18 = arith.constant 0 : index
      %c0_19 = arith.constant 0 : index
      %c0_20 = arith.constant 0 : index
      %41 = vector.load %arg6[%c0_18, %c0_19, %c0_20] : memref<1x24x256xf32, #tpu.memory_space<vmem>>, vector<1x24x256xf32>
      %42 = vector.shape_cast %41 : vector<1x24x256xf32> to vector<24x256xf32>
      %43 = vector.shape_cast %40 : vector<24x256xf32> to vector<1x24x256xf32>
      tpu.vector_store %arg6[%c0_18, %c0_19, %c0_20], %43 {strides = array<i32>} : memref<1x24x256xf32, #tpu.memory_space<vmem>>, vector<1x24x256xf32>,
    } else {
    }
    return
  }
  func.func @transform_0(%arg0: i32, %arg1: i32, %arg2: memref<2xi32, #tpu.memory_space<smem>>) -> (i32, i32, i32) {
    %c0_i32 = arith.constant 0 : i32
    %c0_i32_0 = arith.constant 0 : i32
    return %arg0, %arg1, %c0_i32 : i32, i32, i32
  }
  func.func @transform_1(%arg0: i32, %arg1: i32, %arg2: memref<2xi32, #tpu.memory_space<smem>>) -> (i32, i32, i32) {
    %c1_i32 = arith.constant 1 : i32
    %0 = arith.addi %arg1, %c1_i32 : i32
    %c3_i32 = arith.constant 3 : i32
    %1 = arith.muli %0, %c3_i32 : i32
    %c0_i32 = arith.constant 0 : i32
    %c0_i32_0 = arith.constant 0 : i32
    return %arg0, %1, %c0_i32 : i32, i32, i32
  }
  func.func @transform_2(%arg0: i32, %arg1: i32, %arg2: memref<2xi32, #tpu.memory_space<smem>>) -> (i32, i32) {
    %c0_i32 = arith.constant 0 : i32
    %c0_i32_0 = arith.constant 0 : i32
    %c0_i32_1 = arith.constant 0 : i32
    return %c0_i32, %c0_i32_0 : i32, i32
  }
  func.func @transform_3(%arg0: i32, %arg1: i32, %arg2: memref<2xi32, #tpu.memory_space<smem>>) -> (i32, i32, i32) {
    %c0_i32 = arith.constant 0 : i32
    %c0_i32_0 = arith.constant 0 : i32
    return %arg0, %arg1, %c0_i32 : i32, i32, i32
  }
}

</mosaic_0001>

<bundles_post_ra>
// kernel: tpu_custom_call.1
= control target key start
LH: loop header
LB: loop body
LE: loop exit
PB: predicated region body
PF: predicated region fallthrough
CT: control target
= control target key end

     0   :  { %s1142_s0 = inlined_call_operand.vmem [shape: s32[2], index: 0, kind: input, shape index: {}]   ;;  %s1143_s1 = inlined_call_operand.vmem [shape: f32[2,32,16], index: 1, kind: input, shape index: {}]   ;;  %s1144_s2 = inlined_call_operand.vmem [shape: f32[2,32,16], index: 2, kind: input, shape index: {}]   ;;  %s1145_s3 = inlined_call_operand.vmem [shape: bf16[64,256], index: 3, kind: input, shape index: {}]   ;;  %s1146_s4 = inlined_call_operand.hbm [shape: f32[2,24,256], index: 4, kind: output, shape index: {}]  }
   0x1   :  { %s9_s17 = sshll.u32 %s1142_s0, 4  ;;  %s10_s17 = int_to_ptr.vmem [resolvable:$true] %s9_s17 }
   0x2   :  { %s800_s18 = scalar_lea.vmem %s10_s17, 16  ;;  %p805_p1 = scmp.lt.s32.totalorder %s10_s17, %s10_s17 }
   0x3   :  { %p801_p0 = scmp.ne.s32.totalorder %s10_s17, %s800_s18  ;;  %p806_p2 = scmp.lt.s32.totalorder %s800_s18, %s800_s18 }
   0x5   :  { %p807_p3 = por %p806_p2, %p805_p1 }
   0x7   :  { %p808_p4 = pnand %p807_p3, %p801_p0 }
   0x9   :  { %811 = shalt.err (!%p808_p4)  }
   0xa   :  { %s894_s19 = smov [#allocation4]  }
   0xb   :  { %12 = dma.vmem_to_smem %s10_s17, 16, %s894_s19, [#allocation3] }
   0xc   :  { %864 = dma.done.wait [#allocation3], 16 }
   0xd   :  { %865 = vsyncadd [#allocation3], 4294967280 }
   0xe   :  { %14 = sfence }
   0xf   :  { %15 = vsyncpa [#allocation6], 0 }
  0x10   :  { %17 = vsyncpa [#allocation6 + $0x1], 0  ;;  %s929_s20 = smov 0   ;;  %s931_s21 = smov 0  }
  0x11   :  { %s933_s0 = smov 0   ;;  %s935_s22 = smov 0  }
  0x12   :  { %s937_s23 = smov 0   ;;  %s939_s24 = smov 0  }
  0x13 LB: > { %s659_s25 = sadd.s32 4294967295, %s892_s24   ;;  %s660_s26 = sadd.s32 4294967294, %s892_s24   ;;  %s892_s24 = sphi %s939_s24, %s23_s24   ;;  %s888_s23 = sphi %s937_s23, %s1153_s23   ;;  %s884_s22 = sphi %s935_s22, %s1152_s22   ;;  %s880_s0 = sphi %s933_s0, %s1151_s0   ;;  %s876_s21 = sphi %s931_s21, %s1150_s21   ;;  %s872_s20 = sphi %s929_s20, %s1149_s20  }
  0x14   : > { %s35_s27 = sadd.s32 1, %s888_s23  ;;  %s125_s28 = sadd.s32 1, %s880_s0 }
  0x15   : > { %p37_p5 = scmp.ge.s32.totalorder %s35_s27, 2  ;;  %p135_p6 = scmp.ne.s32.totalorder %s880_s0, %s876_s21 }
  0x16   : > { %p136_p7 = scmp.eq.s32.totalorder %s659_s25, 1  ;;  %p141_p8 = scmp.ne.s32.totalorder %s876_s21, %s872_s20 }
  0x17   : > { %s1155_s27 = smov (%p37_p5, %s35_s27), 0  ;;  %p142_p10 = scmp.eq.s32.totalorder %s660_s26, 1 }
  0x18   : > { %p969_p9 = por %p136_p7, %p135_p6  ;;  %s120_s30 = ssub.s32 %s888_s23, %s1155_s27 }
  0x19   : > { %p663_p11 = scmp.ge.s32.totalorder %s892_s24, 1  ;;  %p123_p12 = scmp.eq.s32.totalorder %s120_s30, 0 }
  0x1a   : > { %p976_p13 = por %p142_p10, %p141_p8  ;;  %p199_p0 = scmp.lt.s32.totalorder %s892_s24, 3 }
  0x1b   : > { %s982_s6 = scalar_select %p123_p12, %s880_s0, %s125_s28  }
  0x1c   : > { %p200_p1 = pnand %p663_p11, %p199_p0 }
  0x1d   : > { %p246_p2 = scmp.lt.s32.totalorder (!%p200_p1), %s884_s22, 1  ;;  %v299_v0 = vlaneseq (!%p200_p1)  ;;  %v786_v2 = vld [vmem:[%s1145_s3 + $0x4] ss:$8 sps:$4 sm:$0xff] (!%p200_p1)   ;;  %s238_s10 = sand.u32 (!%p200_p1), 1, %s876_s21   ;;  %v788_v3 = vld [vmem:[%s1145_s3] ss:$8 sps:$4 sm:$0xff] (!%p200_p1)  }
  0x1e   : > { %203 = sbr.rel (%p200_p1) target bundleno = 436 (0x1b4), region = 32  ;;  %456 = vmatprep.subr.bf16.mxu0 (!%p200_p1), %v786_v2  ;;  %715 = vmatprep.subr.bf16.mxu1 (!%p200_p1), %v786_v2  ;;  %v789_v16 = vld [vmem:[%s1145_s3 + $0x14] ss:$8 sps:$4 sm:$0xff] (!%p200_p1)   ;;  %v791_v19 = vld [vmem:[%s1145_s3 + $0x10] ss:$8 sps:$4 sm:$0xff] (!%p200_p1)   ;;  %vm291_vm2 = vcmask (!%p200_p1), 125952  }
  0x1f   : > { %v986_v1 = vshrl.u32 (!%p200_p1), %v299_v0, 7  ;;  %s997_s14 = smul.u32 (!%p200_p1), 48, %s238_s10  ;;  %457 = vmatpush1.bf16.msra.mxu0 (!%p200_p1), %v788_v3  ;;  %719 = vmatpush1.bf16.msra.mxu1 (!%p200_p1), %v788_v3  ;;  %v792_v24 = vld [vmem:[%s1145_s3 + $0x24] ss:$8 sps:$4 sm:$0xff] (!%p200_p1)   ;;  %v794_v26 = vld [vmem:[%s1145_s3 + $0x20] ss:$8 sps:$4 sm:$0xff] (!%p200_p1)  }
  0x20   : > { %458 = vmatprep.subr.bf16.mxu0 (!%p200_p1), %v789_v16  ;;  %s895_s15 = smov (!%p200_p1), 32   ;;  %s896_s16 = smov (!%p200_p1), 16   ;;  %716 = vmatprep.subr.bf16.mxu1 (!%p200_p1), %v789_v16  ;;  %v795_v36 = vld [vmem:[%s1145_s3 + $0x34] ss:$8 sps:$4 sm:$0xff] (!%p200_p1)   ;;  %v797_v37 = vld [vmem:[%s1145_s3 + $0x30] ss:$8 sps:$4 sm:$0xff] (!%p200_p1)  }
  0x21   : > { %vm332_vm0 = vcmp.lt.s32.totalorder (!%p200_p1), %v986_v1, 6  ;;  %vm301_vm1 = vcmp.lt.s32.totalorder (!%p200_p1), %v986_v1, 7  ;;  %vm363_vm3 = vcmp.lt.s32.totalorder (!%p200_p1), %v986_v1, 5  ;;  %v897_v43 = vmov (!%p200_p1), 0   ;;  %s507_s28 = sld [smem:[#allocation4 + %s884_s22]] (!%p200_p1)  ;;  %s1067_s30 = scalar_lea.vmem (!%p200_p1), [#allocation5], %s997_s14 }
  0x22   : > { %488 = vmatprep.mubr.bf16.mxu0 (!%p200_p1), %v897_v43  ;;  %498 = vmatprep.mubr.bf16.mxu1 (!%p200_p1), %v897_v43  ;;  %vm324_vm4 = vcmask (!%p200_p1), 257152   ;;  %vm355_vm5 = vcmask (!%p200_p1), 388352   ;;  %vm386_vm6 = vcmask (!%p200_p1), 519552   ;;  %vm449_vm7 = vcmask (!%p200_p1), 523264  }
  0x23   : > { %459 = vmatpush1.bf16.msra.mxu0 (!%p200_p1), %v791_v19  ;;  %720 = vmatpush1.bf16.msra.mxu1 (!%p200_p1), %v791_v19 }
  0x24   : > { %460 = vmatprep.subr.bf16.mxu0 (!%p200_p1), %v792_v24  ;;  %717 = vmatprep.subr.bf16.mxu1 (!%p200_p1), %v792_v24 }
  0x25   : > { %s247_s7 = scalar_select %p246_p2, %s884_s22, 1 }
  0x27   : > { %s699_s13 = sshll.u32 %s247_s7, 5  ;;  %461 = vmatpush1.bf16.msra.mxu0 %v794_v26  ;;  %721 = vmatpush1.bf16.msra.mxu1 %v794_v26  ;;  %p693_p3 = scmp.lt.s32.totalorder %s507_s28, 24 }
  0x28   : > { %s253_s17 = scalar_lea.vmem %s1143_s1, %s699_s13  ;;  %s701_s18 = sadd.s32 24, %s699_s13  ;;  %462 = vmatprep.subr.bf16.mxu0 %v795_v36  ;;  %718 = vmatprep.subr.bf16.mxu1 %v795_v36 }
  0x29   : > { %v274_v4 = vld [vmem:[%s253_s17] sm:$0xff]  ;;  %v275_v5 = vld [vmem:[%s253_s17 + $0x8] sm:$0xff]  ;;  %s268_s26 = scalar_lea.vmem %s1144_s2, %s701_s18  ;;  %v1007_v6 = vld [vmem:[%s253_s17 + $0x10] sm:$0xff] }
  0x2a   : > { %v328_v7 = vrot.slane %v274_v4, 2  ;;  %v329_v8 = vrot.slane %v275_v5, 2  ;;  %v295_v9 = vrot.slane %v274_v4, 1  ;;  %v296_v10 = vrot.slane %v275_v5, 1  ;;  %v1009_v11 = vld [vmem:[%s268_s26] sm:$0xff]  ;;  %s898_s26 = smov 48  }
  0x2b   : > { %v297_v12 = vrot.slane %v1007_v6, 1  ;;  %v298_v13 = vrot.slane %v1009_v11, 1  ;;  %v330_v14 = vrot.slane %v1007_v6, 2  ;;  %v331_v15 = vrot.slane %v1009_v11, 2  ;;  %463 = vmatpush1.bf16.msra.mxu0 %v797_v37  ;;  %722 = vmatpush1.bf16.msra.mxu1 %v797_v37 }
  0x2c   : > { %v335_v17 = vsel %vm332_vm0, %v328_v7, %v329_v8  ;;  %v304_v18 = vsel %vm301_vm1, %v295_v9, %v296_v10  ;;  %v360_v25 = vrot.slane %v275_v5, 3  ;;  %v361_v30 = vrot.slane %v1007_v6, 3 }
  0x2d   : > { %v708_v20 = vpack.c.bf16 %v335_v17, %v335_v17  ;;  %v705_v21 = vpack.c.bf16 %v304_v18, %v304_v18  ;;  %v302_v22 = vsel %vm301_vm1, %v297_v12, %v298_v13  ;;  %v303_v23 = vsel %vm301_vm1, %v296_v10, %v297_v12 }
  0x2e   : > { %v707_v27 = vpack.c.bf16 %v302_v22, %v302_v22  ;;  %v706_v28 = vpack.c.bf16 %v303_v23, %v303_v23  ;;  %v333_v29 = vsel %vm332_vm0, %v330_v14, %v331_v15  ;;  %v334_v31 = vsel %vm332_vm0, %v329_v8, %v330_v14 }
  0x2f   : > { %346 = vrot.lane.b32.xlu1 %v708_v20, %s895_s15  ;;  %315 = vrot.lane.b32.xlu0 %v705_v21, %s896_s16  ;;  %v359_v32 = vrot.slane %v274_v4, 3  ;;  %v702_v33 = vpack.c.bf16 %v274_v4, %v274_v4  ;;  %v704_v34 = vpack.c.bf16 %v1007_v6, %v1007_v6  ;;  %v703_v35 = vpack.c.bf16 %v275_v5, %v275_v5 }
  0x30   : > { %v710_v38 = vpack.c.bf16 %v333_v29, %v333_v29  ;;  %v709_v39 = vpack.c.bf16 %v334_v31, %v334_v31  ;;  %v365_v40 = vsel %vm363_vm3, %v360_v25, %v361_v30  ;;  %v362_v42 = vrot.slane %v1009_v11, 3 }
  0x31   : > { %292 = vst.msk [vmem:[#allocation2] sm:$0xf] %vm291_vm2, %v702_v33  ;;  %294 = vst.msk [vmem:[#allocation2 + $0x8] sm:$0xf] %vm291_vm2, %v704_v34  ;;  %v366_v41 = vsel %vm363_vm3, %v359_v32, %v360_v25  ;;  %v712_v44 = vpack.c.bf16 %v365_v40, %v365_v40 }
  0x32   : > { %293 = vst.msk [vmem:[#allocation2 + $0x4] sm:$0xf] %vm291_vm2, %v703_v35  ;;  %v711_v45 = vpack.c.bf16 %v366_v41, %v366_v41  ;;  %v364_v46 = vsel %vm363_vm3, %v361_v30, %v362_v42 }
  0x33   : > { %319 = vrot.lane.b32.xlu1 %v707_v27, %s896_s16  ;;  %317 = vrot.lane.b32.xlu0 %v706_v28, %s896_s16  ;;  %v713_v47 = vpack.c.bf16 %v364_v46, %v364_v46 }
  0x37   : > { %350 = vrot.lane.b32.xlu1 %v710_v38, %s895_s15  ;;  %348 = vrot.lane.b32.xlu0 %v709_v39, %s895_s15 }
  0x3b   : > { %379 = vrot.lane.b32.xlu1 %v712_v44, %s898_s26  ;;  %377 = vrot.lane.b32.xlu0 %v711_v45, %s898_s26 }
  0x3f   : > { %381 = vrot.lane.b32.xlu0 %v713_v47, %s898_s26 }
  0xa1   : > { %v347_v48 = vpop.permute.xlu1 %346  ;;  %v316_v49 = vpop.permute.xlu0 %315 }
  0xa2   : > { %325 = vst.msk [vmem:[#allocation2] sm:$0xf] %vm324_vm4, %v316_v49 }
  0xa3   : > { %356 = vst.msk [vmem:[#allocation2] sm:$0xf] %vm355_vm5, %v347_v48 }
  0xa5   : > { %v320_v50 = vpop.permute.xlu1 %319  ;;  %v318_v51 = vpop.permute.xlu0 %317 }
  0xa6   : > { %327 = vst.msk [vmem:[#allocation2 + $0x8] sm:$0xf] %vm324_vm4, %v320_v50  ;;  %326 = vst.msk [vmem:[#allocation2 + $0x4] sm:$0xf] %vm324_vm4, %v318_v51 }
  0xa9   : > { %v351_v52 = vpop.permute.xlu1 %350  ;;  %v349_v53 = vpop.permute.xlu0 %348 }
  0xaa   : > { %358 = vst.msk [vmem:[#allocation2 + $0x8] sm:$0xf] %vm355_vm5, %v351_v52  ;;  %357 = vst.msk [vmem:[#allocation2 + $0x4] sm:$0xf] %vm355_vm5, %v349_v53 }
  0xad   : > { %v380_v54 = vpop.permute.xlu1 %379  ;;  %v378_v55 = vpop.permute.xlu0 %377 }
  0xae   : > { %388 = vst.msk [vmem:[#allocation2 + $0x4] sm:$0xf] %vm386_vm6, %v380_v54  ;;  %387 = vst.msk [vmem:[#allocation2] sm:$0xf] %vm386_vm6, %v378_v55 }
  0xb1   : > { %v382_v56 = vpop.permute.xlu0 %381 }
  0xb2   : > { %389 = vst.msk [vmem:[#allocation2 + $0x8] sm:$0xf] %vm386_vm6, %v382_v56 }
  0xb5   : > { %v798_v57 = vld [vmem:[#allocation2] sm:$0xff]  }
  0xb6   : > { %690 = vmatmul.mubr.msk.bf16.vlgmr.msra.gmra.mrb[0].mxu0 %vm449_vm7, %v798_v57 }
  0xb9   : > { %v799_v58 = vld [vmem:[#allocation2 + $0x8] ss:$0 sps:$4 sm:$0xff]  }
  0xba   : > { %691 = vmatmul.mubr.msk.bf16.vlgmr.msra.gmra.mrb[0].mxu1 %vm449_vm7, %v799_v58 }
 0x189   : > { %v490_v59 = vpop.f32.mrb[0].mxu0 }
 0x18a   : > { %v492_v60 = vpop.f32.mrb[1].mxu0  ;;  %512 = sbr.rel (%p693_p3) target bundleno = 401 (0x191), region = 36  ;;  %513 = vst [vmem:[%s1067_s30] sm:$0xff] (!%p693_p3), %v490_v59 }
 0x18b   : > { %v494_v61 = vpop.f32.mrb[2].mxu0  ;;  %514 = vst [vmem:[%s1067_s30 + $0x8] sm:$0xff] (!%p693_p3), %v492_v60 }
 0x18c   : > { %v496_v62 = vpop.f32.mrb[3].mxu0  ;;  %515 = vst [vmem:[%s1067_s30 + $0x10] sm:$0xff] (!%p693_p3), %v494_v61 }
 0x18d   : > { %v500_v63 = vpop.f32.mrb[0].mxu1  ;;  %516 = vst [vmem:[%s1067_s30 + $0x18] sm:$0xff] (!%p693_p3), %v496_v62 }
 0x18e   : > { %v502_v0 = vpop.f32.mrb[1].mxu1  ;;  %517 = vst [vmem:[%s1067_s30 + $0x20] sm:$0xff] (!%p693_p3), %v500_v63 }
 0x18f   : > { %v504_v2 = vpop.f32.mrb[2].mxu1  ;;  %518 = vst [vmem:[%s1067_s30 + $0x28] sm:$0xff] (!%p693_p3), %v502_v0 }
 0x190   : > { %v505_v3 = vpop.f32.mrb[3].mxu1 }
 0x191 PF: > { %p695_p4 = scmp.ge.s32.totalorder %s507_s28, 24 }
 0x192   : > { %v529_v4 = vstv (!%p695_p4), %s507_s28  ;;  %v523_v5 = vadd.s32 (!%p695_p4), 8, %v986_v1  ;;  %v524_v6 = vadd.s32 (!%p695_p4), 16, %v986_v1 }
 0x193   : > { %522 = sbr.rel (%p695_p4) target bundleno = 410 (0x19a), region = 40  ;;  %vm530_vm8 = vcmp.lt.s32.totalorder (!%p695_p4), %v986_v1, %v529_v4 }
 0x194   : > { %v533_v7 = vsel (!%p695_p4), %vm530_vm8, %v490_v59, 0.0  ;;  %v534_v8 = vsel (!%p695_p4), %vm530_vm8, %v492_v60, 0.0  ;;  %vm531_vm9 = vcmp.lt.s32.totalorder (!%p695_p4), %v523_v5, %v529_v4  ;;  %vm532_vm10 = vcmp.lt.s32.totalorder (!%p695_p4), %v524_v6, %v529_v4 }
 0x195   : > { %539 = vst [vmem:[%s1067_s30] sm:$0xff] (!%p695_p4), %v533_v7  ;;  %540 = vst [vmem:[%s1067_s30 + $0x8] sm:$0xff] (!%p695_p4), %v534_v8  ;;  %v535_v9 = vsel (!%p695_p4), %vm531_vm9, %v494_v61, 0.0  ;;  %v536_v10 = vsel (!%p695_p4), %vm531_vm9, %v496_v62, 0.0  ;;  %v537_v11 = vsel (!%p695_p4), %vm532_vm10, %v500_v63, 0.0  ;;  %v538_v12 = vsel (!%p695_p4), %vm532_vm10, %v502_v0, 0.0 }
 0x196   : > { %541 = vst [vmem:[%s1067_s30 + $0x10] sm:$0xff] (!%p695_p4), %v535_v9  ;;  %542 = vst [vmem:[%s1067_s30 + $0x18] sm:$0xff] (!%p695_p4), %v536_v10 }
 0x197   : > { %543 = vst [vmem:[%s1067_s30 + $0x20] sm:$0xff] (!%p695_p4), %v537_v11  ;;  %544 = vst [vmem:[%s1067_s30 + $0x28] sm:$0xff] (!%p695_p4), %v538_v12 }
 0x19a PF: > { %s724_s14 = smul.u32 768, %s884_s22  ;;  %s562_s7 = sshll.u32 %s1067_s30, 4  ;;  %s1091_s7 = int_to_ptr.vmem [resolvable:$true] %s562_s7 }
 0x19b   : > { %s1095_s12 = scalar_lea.sflag [#allocation6], %s238_s10  ;;  %s812_s13 = scalar_lea.vmem %s1091_s7, 768 }
 0x19c   : > { %s1089_s11 = scalar_lea.hbm %s1146_s4, %s724_s14  ;;  %p813_p5 = scmp.ne.s32.totalorder %s1091_s7, %s812_s13 }
 0x19d   : > { %s899_s22 = smov [#allocation5]  }
 0x19e   : > { %p814_p6 = pnand %p813_p5, %p969_p9  ;;  %s816_s15 = sshll.u32 %s899_s22, 4  ;;  %s817_s15 = int_to_ptr.vmem [resolvable:$false] %s816_s15 }
 0x19f   : > { %s818_s17 = scalar_lea.vmem %s817_s15, 1536  ;;  %p819_p8 = scmp.lt.s32.totalorder %s1091_s7, %s817_s15 }
 0x1a0   : > { %p815_p7 = pneg %p814_p6  ;;  %p820_p10 = scmp.lt.s32.totalorder %s818_s17, %s812_s13 }
 0x1a2   : > { %p821_p11 = por %p820_p10, %p819_p8 }
 0x1a4   : > { %p822_p12 = pnand %p821_p11, %p815_p7 }
 0x1a6   : > { %825 = shalt.err (!%p822_p12)
}
 0x1a7   : > { %s826_s10 = scalar_lea.hbm %s1089_s11, 768  ;;  %s830_s25 = scalar_lea.hbm %s1146_s4, 1536 }
 0x1a8   : > { %p827_p0 = scmp.ne.s32.totalorder %s1089_s11, %s826_s10  ;;  %p831_p3 = scmp.lt.u32.totalorder %s1089_s11, %s1146_s4 }
 0x1a9   : > { %p832_p4 = scmp.lt.u32.totalorder %s830_s25, %s826_s10  ;;  %p834_p6 = scmp.lt.u32.totalorder %s826_s10, %s1089_s11 }
 0x1aa   : > { %p828_p1 = pnand %p827_p0, %p969_p9 }
 0x1ab   : > { %p833_p5 = por %p832_p4, %p831_p3 }
 0x1ac   : > { %p829_p2 = pneg %p828_p1 }
 0x1ad   : > { %p835_p7 = por %p834_p6, %p833_p5 }
 0x1af   : > { %p836_p8 = pnand %p835_p7, %p829_p2 }
 0x1b1   : > { %839 = shalt.err (!%p836_p8)
}
 0x1b2   : > { %s900_s30 = smov 256  }
 0x1b3   : > { %725 = dma.vmem_to_hbm [thread:$0]  (%p969_p9), %s1091_s7, 768, %s1089_s11, %s1095_s12, %s900_s30, %s900_s30, %s896_s16  }
 0x1b4 PF: > { %p731_p10 = scmp.ge.s32.totalorder %s892_s24, 2  ;;  %s577_s14 = sand.u32 1, %s872_s20  }
 0x1b5   : > { %s578_s8 = scalar_lea.sflag [#allocation6], %s577_s14 }
 0x1b6   : > { %p728_p11 = pnand %p731_p10, %p976_p13 }
 0x1b8   : > { %867 = dma.done.wait (!%p728_p11), %s578_s8, 768  }
 0x1b9   : > { %869 = vsyncadd (!%p728_p11), %s578_s8, 4294966528  ;;  %s23_s24 = sadd.s32 1, %s892_s24   ;;  %s1149_s20 = smov %s876_s21 }
 0x1ba   : > { %p20_p12 = scmp.ge.s32.totalorder %s23_s24, 4   ;;  %s1150_s21 = smov %s880_s0 }
 0x1bb   : > { %s1151_s0 = smov %s982_s6  ;;  %s1152_s22 = smov %s888_s23 }
 0x1bc   : > { %s1153_s23 = smov %s1155_s27  ;;  %22 = sbr.rel (!%p20_p12) target bundleno = 19 (0x13), region = 78 }
 0x1c3   :  { %583 = vsyncpa [#allocation6], 1 }
 0x1c4   :  { %585 = vsyncpa [#allocation6 + $0x1], 1 }

</bundles_post_ra>
